<compile_context>
chip_gen: v6e
topology: v6e:2x2x1
jax: 0.10.0
libtpu: 0.0.40
codegen_flags: <defaults>
</compile_context>

<pallas_src>
import numpy as np
import jax
import jax.numpy as jnp
from jax.experimental import pallas as pl
from jax.experimental.pallas import tpu as pltpu

# --- hyperparameters from the PyTorch module ---
CIN, COUT, K, STRIDE, DIL, PAD = 16, 14, 4, 4, 2, 8
GROUPS = 2                      # see TODO(synk) above
CIN_G = CIN // GROUPS           # 8
COUT_G = COUT // GROUPS         # 7

NPH = 4                         # output phases: (a_h, a_w) in {0,1}^2 on the even grid
TAPS = 4                        # live taps per output position: (dh, dw) in {0,1}^2
KC_G = TAPS * CIN_G             # 32  contraction per group
KC = GROUPS * KC_G              # 64  block-diagonal contraction
ROWS = GROUPS * NPH * COUT_G    # 56  output rows (g, a_h, a_w, co)


def _phase_matmul_sigmoid_kernel(b_ref, a_ref, o_ref):
    # b_ref: (ROWS, KC)   block-diagonal polyphase weights
    # a_ref: (KC, M_pad)  lane-dense 2x2-tap im2col of the cropped input
    # o_ref: (ROWS, M_pad)
    acc = jnp.dot(b_ref[...], a_ref[...], preferred_element_type=jnp.float32)
    o_ref[...] = (1.0 / (1.0 + jnp.exp(-acc))).astype(o_ref.dtype)


def conv_transpose_sigmoid(x_nchw, w_pt):
    """x_nchw: (1, CIN, H, W) f32;  w_pt: (CIN, COUT_G, K, K) f32 (PyTorch layout)."""
    N, C, H, W = x_nchw.shape
    assert N == 1 and C == CIN and H == W and H >= 4
    OH = (H - 1) * STRIDE - 2 * PAD + DIL * (K - 1) + 1      # 4H - 13 (= 59)
    OW = OH
    QH = H - 3                                               # per-phase extent (15)
    QW = QH
    M = QH * QW                                              # 225
    M_pad = ((M + 127) // 128) * 128                         # 256
    EV = 2 * QH                                              # even-(oh,ow) extent (30)
    assert EV == (OH + 1) // 2
    dt = jnp.float32

    # --- glue: parity-reduced input -> 2x2-tap im2col, lane-dense along M ---
    y = x_nchw[0, :, 1:H - 1, 1:W - 1].astype(dt)            # (CIN, H-2, W-2)
    yg = y.reshape(GROUPS, CIN_G, H - 2, W - 2)
    taps = [yg[:, :, dh:dh + QH, dw:dw + QW] for dh in (0, 1) for dw in (0, 1)]
    A = jnp.stack(taps, axis=1)                              # (G, 4, CIN_G, QH, QW)
    A = A.reshape(KC, M)                                     # rows: g*32 + (dh*2+dw)*8 + c
    A = jnp.pad(A, ((0, 0), (0, M_pad - M)))                 # (64, 256)

    # --- glue: polyphase weights.  Live tap (dh, dw) of phase (a_h, a_w) uses
    #     kernel tap kh = a_h + 2*(1-dh), kw = a_w + 2*(1-dw). ---
    wg = w_pt.astype(dt).reshape(GROUPS, CIN_G, COUT_G, K, K)
    KI = np.arange(2)[:, None] + 2 * (1 - np.arange(2)[None, :])   # KI[a, d]
    B = wg[:, :, :, KI[:, :, None, None], KI[None, None, :, :]]    # (G,c,co,a_h,dh,a_w,dw)
    B = B.transpose(0, 3, 5, 2, 4, 6, 1).reshape(GROUPS, NPH * COUT_G, KC_G)  # (2,28,32)
    zero = jnp.zeros((NPH * COUT_G, KC_G), dt)
    B_bd = jnp.concatenate(
        [jnp.concatenate([B[g] if gg == g else zero for gg in range(GROUPS)], axis=1)
         for g in range(GROUPS)], axis=0)                    # (56, 64) block-diagonal

    # --- hot path: single lane-dense matmul + fused sigmoid ---
    out = pl.pallas_call(
        _phase_matmul_sigmoid_kernel,
        out_shape=jax.ShapeDtypeStruct((ROWS, M_pad), dt),
        grid=(1,),
        in_specs=[pl.BlockSpec((ROWS, KC), lambda i: (0, 0)),
                  pl.BlockSpec((KC, M_pad), lambda i: (0, 0))],
        out_specs=pl.BlockSpec((ROWS, M_pad), lambda i: (0, 0)),
        compiler_params=pltpu.CompilerParams(
            dimension_semantics=("arbitrary",)),
        cost_estimate=pl.CostEstimate(
            flops=2 * ROWS * KC * M_pad,
            transcendentals=ROWS * M_pad,
            bytes_accessed=4 * (ROWS * KC + KC * M_pad + ROWS * M_pad)),
    )(B_bd, A)

    # --- glue: scatter the even-(oh,ow) grid into the full output; everything the
    #     transposed conv never touches is exactly sigmoid(0) = 0.5 ---
    out = out[:, :M].reshape(GROUPS, 2, 2, COUT_G, QH, QW)   # (g, a_h, a_w, co, q_h, q_w)
    out = out.transpose(0, 3, 4, 1, 5, 2)                    # (g, co, q_h, a_h, q_w, a_w)
    even = out.reshape(COUT, EV, EV)                         # channel = g*COUT_G + co
    full = jnp.full((COUT, OH, OW), 0.5, dt)
    full = full.at[:, ::2, ::2].set(even)
    return full[None]                                        # NCHW (1, COUT, OH, OW)


conv_transpose_sigmoid_jit = jax.jit(conv_transpose_sigmoid)


def _ref_numpy(x, w):
    """Direct scatter-form ConvTranspose2d (groups=2) + sigmoid reference in numpy."""
    N, Cin, H, W = x.shape
    OH = (H - 1) * STRIDE - 2 * PAD + DIL * (K - 1) + 1
    out = np.zeros((N, COUT, OH, OH), np.float32)
    for g in range(GROUPS):
        xg = x[:, g * CIN_G:(g + 1) * CIN_G]
        wg = w[g * CIN_G:(g + 1) * CIN_G]
        for ih in range(H):
            for iw in range(W):
                for kh in range(K):
                    for kw in range(K):
                        oh = ih * STRIDE + kh * DIL - PAD
                        ow = iw * STRIDE + kw * DIL - PAD
                        if 0 <= oh < OH and 0 <= ow < OH:
                            out[:, g * COUT_G:(g + 1) * COUT_G, oh, ow] += (
                                xg[:, :, ih, iw] @ wg[:, :, kh, kw])
    return 1.0 / (1.0 + np.exp(-out))


if __name__ == "__main__":
    key = jax.random.PRNGKey(0)
    kx, kw = jax.random.split(key)
    # input matches the module's driver: torch.randn(1, 16, 18, 18)
    x1 = jax.random.normal(kx, (1, CIN, 18, 18), dtype=jnp.float32)
    # deterministic synthetic weight, PyTorch ConvTranspose2d layout (CIN, COUT//groups, K, K)
    w = jax.random.normal(kw, (CIN, COUT_G, K, K), dtype=jnp.float32) * 0.1

    y_out = jax.block_until_ready(conv_transpose_sigmoid_jit(x1, w))

    y_ref = _ref_numpy(np.asarray(x1), np.asarray(w))
    assert y_out.shape == y_ref.shape == (1, COUT, 59, 59), (y_out.shape, y_ref.shape)
    np.testing.assert_allclose(np.asarray(y_out), y_ref, atol=1e-4, rtol=1e-4)
    print("KERNEL_OK")
</pallas_src>

<mosaic_0001>
module attributes {stable_mosaic.version = 11 : i64} {
  func.func @_phase_matmul_sigmoid_kernel(%arg0: i32, %arg1: memref<56x64xf32, #tpu.memory_space<vmem>>, %arg2: memref<64x256xf32, #tpu.memory_space<vmem>>, %arg3: memref<56x256xf32, #tpu.memory_space<vmem>>) attributes {dimension_semantics = [#tpu.dimension_semantics<arbitrary>], iteration_bounds = array<i64: 1>, scalar_prefetch = 0 : i64, scratch_operands = 0 : i64, tpu.core_type = #tpu.core_type<tc>, window_params = [{pipeline_mode = #tpu.pipeline_mode<synchronous>, transform_indices = @transform_0, window_bounds = array<i64: 56, 64>}, {pipeline_mode = #tpu.pipeline_mode<synchronous>, transform_indices = @transform_1, window_bounds = array<i64: 64, 256>}, {pipeline_mode = #tpu.pipeline_mode<synchronous>, transform_indices = @transform_2, window_bounds = array<i64: 56, 256>}]} {
    %c0 = arith.constant 0 : index
    %c0_0 = arith.constant 0 : index
    %0 = vector.load %arg1[%c0, %c0_0] : memref<56x64xf32, #tpu.memory_space<vmem>>, vector<56x64xf32>
    %c0_1 = arith.constant 0 : index
    %c0_2 = arith.constant 0 : index
    %1 = vector.load %arg2[%c0_1, %c0_2] : memref<64x256xf32, #tpu.memory_space<vmem>>, vector<64x256xf32>
    %cst = arith.constant dense<0.000000e+00> : vector<56x256xf32>
    %2 = tpu.matmul %0, %1, %cst {dimension_numbers = #tpu.dot_dimension_numbers<[1], [0], [0], [1], [0, 0, 1, 1], [], []>} : vector<56x64xf32>, vector<64x256xf32>, vector<56x256xf32> -> vector<56x256xf32>
    %cst_3 = arith.constant 0.000000e+00 : f32
    %3 = vector.broadcast %cst_3 : f32 to vector<56x256xf32>
    %4 = arith.subf %3, %2 : vector<56x256xf32>
    %5 = math.exp %4 : vector<56x256xf32>
    %cst_4 = arith.constant 1.000000e+00 : f32
    %6 = vector.broadcast %cst_4 : f32 to vector<56x256xf32>
    %7 = arith.addf %6, %5 : vector<56x256xf32>
    %cst_5 = arith.constant 1.000000e+00 : f32
    %8 = vector.broadcast %cst_5 : f32 to vector<56x256xf32>
    %9 = arith.divf %8, %7 : vector<56x256xf32>
    %c0_6 = arith.constant 0 : index
    %c0_7 = arith.constant 0 : index
    %10 = vector.load %arg3[%c0_6, %c0_7] : memref<56x256xf32, #tpu.memory_space<vmem>>, vector<56x256xf32>
    tpu.vector_store %arg3[%c0_6, %c0_7], %9 {strides = array<i32>} : memref<56x256xf32, #tpu.memory_space<vmem>>, vector<56x256xf32>,
    return
  }
  func.func @transform_0(%arg0: i32) -> (i32, i32) {
    %c0_i32 = arith.constant 0 : i32
    %c0_i32_0 = arith.constant 0 : i32
    %c0_i32_1 = arith.constant 0 : i32
    return %c0_i32, %c0_i32_0 : i32, i32
  }
  func.func @transform_1(%arg0: i32) -> (i32, i32) {
    %c0_i32 = arith.constant 0 : i32
    %c0_i32_0 = arith.constant 0 : i32
    %c0_i32_1 = arith.constant 0 : i32
    return %c0_i32, %c0_i32_0 : i32, i32
  }
  func.func @transform_2(%arg0: i32) -> (i32, i32) {
    %c0_i32 = arith.constant 0 : i32
    %c0_i32_0 = arith.constant 0 : i32
    %c0_i32_1 = arith.constant 0 : i32
    return %c0_i32, %c0_i32_0 : i32, i32
  }
}

</mosaic_0001>

<bundles_post_ra>
// kernel: squeeze.4
= control target key start
LH: loop header
LB: loop body
LE: loop exit
PB: predicated region body
PF: predicated region fallthrough
CT: control target
= control target key end

     0   :  { %vm285_vm0 = vcmask 1043458   ;;  %vm289_vm1 = vcmask 1045508   ;;  %vm293_vm2 = vcmask 1047558   ;;  %s754_s22 = smov 3  ;;  %s756_s23 = smov 12  ;;  %vm295_vm3 = vcmask 64512   ;;  %s1089_s0 = inlined_call_operand.vmem [shape: f32[1,2,2,7,2,2,8], index: 0, kind: input, shape index: {}]   ;;  %s1090_s1 = inlined_call_operand.vmem [shape: f32[28,32], index: 1, kind: output, shape index: {}]  }
   0x1   :  { %v687_v0 = vld [vmem:[%s1089_s0 + $0x1e] sm:$0x3]  ;;  %v689_v1 = vld [vmem:[%s1089_s0 + $0x1a] sm:$0x3]  ;;  %v691_v2 = vld [vmem:[%s1089_s0 + $0x16] sm:$0x3] }
   0x2   :  { %209 = vst [vmem:[#allocation0 + $0x78] sm:$0x3] %v687_v0  ;;  %219 = vst [vmem:[#allocation0 + $0x68] sm:$0x3] %v689_v1  ;;  %v693_v3 = vld [vmem:[%s1089_s0 + $0x12] sm:$0x3] }
   0x3   :  { %229 = vst [vmem:[#allocation0 + $0x58] sm:$0x3] %v691_v2  ;;  %v695_v4 = vld [vmem:[%s1089_s0 + $0xe] sm:$0x3]  ;;  %v697_v5 = vld [vmem:[%s1089_s0 + $0xa] sm:$0x3] }
   0x4   :  { %239 = vst [vmem:[#allocation0 + $0x48] sm:$0x3] %v693_v3  ;;  %249 = vst [vmem:[#allocation0 + $0x38] sm:$0x3] %v695_v4  ;;  %v699_v6 = vld [vmem:[%s1089_s0 + $0x6] sm:$0x3] }
   0x5   :  { %259 = vst [vmem:[#allocation0 + $0x28] sm:$0x3] %v697_v5  ;;  %v701_v7 = vld [vmem:[%s1089_s0 + $0x2] sm:$0x3]  ;;  %269 = vst [vmem:[#allocation0 + $0x18] sm:$0x3] %v699_v6 }
   0x6   :  { %278 = vst [vmem:[#allocation0 + $0x8] sm:$0x3] %v701_v7  ;;  %v647_v8 = vld [vmem:[%s1089_s0 + $0x6e] sm:$0x3]  ;;  %s761_s26 = smov 48  ;;  %s763_s27 = smov 192 }
   0x7   :  { %9 = vst [vmem:[#allocation0 + $0x1b8] sm:$0x3] %v647_v8  ;;  %v649_v9 = vld [vmem:[%s1089_s0 + $0x6a] sm:$0x3]  ;;  %v651_v10 = vld [vmem:[%s1089_s0 + $0x66] sm:$0x3] }
   0x8   :  { %19 = vst [vmem:[#allocation0 + $0x1a8] sm:$0x3] %v649_v9  ;;  %29 = vst [vmem:[#allocation0 + $0x198] sm:$0x3] %v651_v10  ;;  %v653_v11 = vld [vmem:[%s1089_s0 + $0x62] sm:$0x3] }
   0x9   :  { %s774_s5 = smov 3  ;;  %v671_v12 = vld [vmem:[%s1089_s0 + $0x3e] sm:$0x3]  ;;  %39 = vst [vmem:[#allocation0 + $0x188] sm:$0x3] %v653_v11  ;;  %s779_s8 = smov 12 }
   0xa   :  { %129 = vst [vmem:[#allocation0 + $0xf8] sm:$0x3] %v671_v12  ;;  %v673_v13 = vld [vmem:[%s1089_s0 + $0x3a] sm:$0x3]  ;;  %v675_v14 = vld [vmem:[%s1089_s0 + $0x36] sm:$0x3] }
   0xb   :  { %s787_s13 = smov 3  ;;  %139 = vst [vmem:[#allocation0 + $0xe8] sm:$0x3] %v673_v13  ;;  %149 = vst [vmem:[#allocation0 + $0xd8] sm:$0x3] %v675_v14  ;;  %s804_s28 = smov 12 }
   0xc   :  { %v677_v15 = vld [vmem:[%s1089_s0 + $0x32] sm:$0x3]  ;;  %v679_v16 = vld [vmem:[%s1089_s0 + $0x2e] sm:$0x3]  ;;  %v681_v17 = vld [vmem:[%s1089_s0 + $0x2a] sm:$0x3] }
   0xd   :  { %159 = vst [vmem:[#allocation0 + $0xc8] sm:$0x3] %v677_v15  ;;  %169 = vst [vmem:[#allocation0 + $0xb8] sm:$0x3] %v679_v16  ;;  %v683_v18 = vld [vmem:[%s1089_s0 + $0x26] sm:$0x3] }
   0xe   :  { %179 = vst [vmem:[#allocation0 + $0xa8] sm:$0x3] %v681_v17  ;;  %v685_v19 = vld [vmem:[%s1089_s0 + $0x22] sm:$0x3]  ;;  %s806_s29 = smov 48  ;;  %s808_s30 = smov 192 }
   0xf   :  { %189 = vst [vmem:[#allocation0 + $0x98] sm:$0x3] %v683_v18  ;;  %199 = vst [vmem:[#allocation0 + $0x88] sm:$0x3] %v685_v19  ;;  %v655_v20 = vld [vmem:[%s1089_s0 + $0x5e] sm:$0x3] }
  0x10   :  { %v657_v21 = vld [vmem:[%s1089_s0 + $0x5a] sm:$0x3]  ;;  %v352_v22 = vld [vmem:[#allocation0 + $0x9] ss:$16 sm:%s754_s22]   ;;  %49 = vst [vmem:[#allocation0 + $0x178] sm:$0x3] %v655_v20 }
  0x11   :  { %v355_v23 = vld [vmem:[#allocation0 + $0x9] ss:$16 sm:%s756_s23]   ;;  %59 = vst [vmem:[#allocation0 + $0x168] sm:$0x3] %v657_v21  ;;  %s500_s22 = smov 3  ;;  %s503_s23 = smov 12 }
  0x12   :  { %v360_v24 = vld [vmem:[#allocation0 + $0x9] ss:$16 sm:%s761_s26]   ;;  %v357_v25 = vsel %vm285_vm0, %v355_v23, %v352_v22  ;;  %v659_v27 = vld [vmem:[%s1089_s0 + $0x56] sm:$0x3]  ;;  %s432_s7 = smov 3  ;;  %s435_s9 = smov 12 }
  0x13   :  { %v365_v26 = vld [vmem:[#allocation0 + $0x9] ss:$16 sm:%s763_s27]   ;;  %v362_v28 = vsel %vm289_vm1, %v360_v24, %v357_v25  ;;  %69 = vst [vmem:[#allocation0 + $0x158] sm:$0x3] %v659_v27  ;;  %v661_v29 = vld [vmem:[%s1089_s0 + $0x52] sm:$0x3] }
  0x14   :  { %v663_v30 = vld [vmem:[%s1089_s0 + $0x4e] sm:$0x3]  ;;  %v367_v31 = vsel %vm293_vm2, %v365_v26, %v362_v28  ;;  %v420_v32 = vld [vmem:[#allocation0 + $0x189] ss:$16 sm:%s774_s5]   ;;  %v501_v34 = vld [vmem:[#allocation0 + $0x188] ss:$16 sm:%s500_s22]  }
  0x15   :  { %v423_v33 = vld [vmem:[#allocation0 + $0x189] ss:$16 sm:%s779_s8]   ;;  %79 = vst [vmem:[#allocation0 + $0x148] sm:$0x3] %v661_v29  ;;  %89 = vst [vmem:[#allocation0 + $0x138] sm:$0x3] %v663_v30 }
  0x16   :  { %s717_s5 = smov 24   ;;  %v425_v35 = vsel %vm285_vm0, %v423_v33, %v420_v32  ;;  %v504_v36 = vld [vmem:[#allocation0 + $0x188] ss:$16 sm:%s503_s23]   ;;  %s440_s8 = smov 48  ;;  %v665_v40 = vld [vmem:[%s1089_s0 + $0x4a] sm:$0x3] }
  0x17   :  { %368 = vrot.lane.b32.xlu0 %v367_v31, %s717_s5  ;;  %v433_v37 = vld [vmem:[#allocation0 + $0x8] ss:$16 sm:%s432_s7]   ;;  %426 = vrot.lane.b32.xlu1 %v425_v35, %s717_s5  ;;  %s445_s15 = smov 192  ;;  %v667_v41 = vld [vmem:[%s1089_s0 + $0x46] sm:$0x3]  ;;  %v506_v45 = vsel %vm285_vm0, %v504_v36, %v501_v34  ;;  %s855_s21 = smov 3 }
  0x18   :  { %v436_v38 = vld [vmem:[#allocation0 + $0x8] ss:$16 sm:%s435_s9]   ;;  %v374_v42 = vld [vmem:[#allocation0 + $0x89] ss:$16 sm:%s787_s13]   ;;  %99 = vst [vmem:[#allocation0 + $0x128] sm:$0x3] %v665_v40 }
  0x19   :  { %v438_v39 = vsel %vm285_vm0, %v436_v38, %v433_v37  ;;  %v377_v43 = vld [vmem:[#allocation0 + $0x89] ss:$16 sm:%s804_s28]   ;;  %109 = vst [vmem:[#allocation0 + $0x118] sm:$0x3] %v667_v41  ;;  %v441_v48 = vld [vmem:[#allocation0 + $0x8] ss:$16 sm:%s440_s8]  }
  0x1a   :  { %v382_v44 = vld [vmem:[#allocation0 + $0x89] ss:$16 sm:%s806_s29]   ;;  %v379_v46 = vsel %vm285_vm0, %v377_v43, %v374_v42  ;;  %v446_v49 = vld [vmem:[#allocation0 + $0x8] ss:$16 sm:%s445_s15]   ;;  %v443_v51 = vsel %vm289_vm1, %v441_v48, %v438_v39  ;;  %v669_v52 = vld [vmem:[%s1089_s0 + $0x42] sm:$0x3] }
  0x1b   :  { %v387_v47 = vld [vmem:[#allocation0 + $0x89] ss:$16 sm:%s808_s30]   ;;  %v384_v50 = vsel %vm289_vm1, %v382_v44, %v379_v46  ;;  %s857_s24 = smov 12  ;;  %v688_v53 = vld [vmem:[%s1089_s0 + $0x1c] sm:$0x3]  ;;  %s718_s29 = smov 16   ;;  %v448_v59 = vsel %vm293_vm2, %v446_v49, %v443_v51 }
  0x1c   :  { %v389_v54 = vsel %vm293_vm2, %v387_v47, %v384_v50  ;;  %507 = vrot.lane.b32.xlu1 %v506_v45, %s718_s29  ;;  %119 = vst [vmem:[#allocation0 + $0x108] sm:$0x3] %v669_v52  ;;  %s864_s30 = smov 48  ;;  %s866_s2 = smov 192  ;;  %214 = vst [vmem:[#allocation0 + $0x70] sm:$0x3] %v688_v53 }
  0x1d   :  { %v690_v55 = vld [vmem:[%s1089_s0 + $0x18] sm:$0x3]  ;;  %v692_v56 = vld [vmem:[%s1089_s0 + $0x14] sm:$0x3]  ;;  %390 = vrot.lane.b32.xlu0 %v389_v54, %s717_s5  ;;  %s875_s23 = smov 3  ;;  %s877_s26 = smov 12 }
  0x1e   :  { %224 = vst [vmem:[#allocation0 + $0x60] sm:$0x3] %v690_v55  ;;  %234 = vst [vmem:[#allocation0 + $0x50] sm:$0x3] %v692_v56  ;;  %v694_v57 = vld [vmem:[%s1089_s0 + $0x10] sm:$0x3] }
  0x1f   :  { %v696_v58 = vld [vmem:[%s1089_s0 + $0xc] sm:$0x3]  ;;  %s886_s11 = smov 48  ;;  %s888_s12 = smov 192  ;;  %244 = vst [vmem:[#allocation0 + $0x40] sm:$0x3] %v694_v57 }
  0x20   :  { %254 = vst [vmem:[#allocation0 + $0x30] sm:$0x3] %v696_v58  ;;  %v698_v60 = vld [vmem:[%s1089_s0 + $0x8] sm:$0x3]  ;;  %v700_v61 = vld [vmem:[%s1089_s0 + $0x4] sm:$0x3] }
  0x21   :  { %s454_s17 = smov 3  ;;  %s457_s18 = smov 12  ;;  %264 = vst [vmem:[#allocation0 + $0x20] sm:$0x3] %v698_v60  ;;  %274 = vst [vmem:[#allocation0 + $0x10] sm:$0x3] %v700_v61  ;;  %449 = vrot.lane.b32.xlu0 %v448_v59, %s718_s29 }
  0x22   :  { %v279_v62 = vld [vmem:[%s1089_s0] sm:$0x3]  ;;  %v672_v63 = vld [vmem:[%s1089_s0 + $0x3c] sm:$0x3]  ;;  %v455_v0 = vld [vmem:[#allocation0 + $0x88] ss:$16 sm:%s454_s17]  }
  0x23   :  { %v458_v1 = vld [vmem:[#allocation0 + $0x88] ss:$16 sm:%s457_s18]   ;;  %s462_s28 = smov 48  ;;  %s467_s3 = smov 192  ;;  %280 = vst [vmem:[#allocation0] sm:$0x3] %v279_v62 }
  0x24   :  { %134 = vst [vmem:[#allocation0 + $0xf0] sm:$0x3] %v672_v63  ;;  %v463_v2 = vld [vmem:[#allocation0 + $0x88] ss:$16 sm:%s462_s28]   ;;  %s513_s4 = smov 3  ;;  %s516_s6 = smov 12  ;;  %v460_v3 = vsel %vm285_vm0, %v458_v1, %v455_v0 }
  0x25   :  { %s521_s22 = smov 48  ;;  %s904_s27 = smov 192  ;;  %v674_v4 = vld [vmem:[%s1089_s0 + $0x38] sm:$0x3]  ;;  %v676_v5 = vld [vmem:[%s1089_s0 + $0x34] sm:$0x3]  ;;  %v465_v18 = vsel %vm289_vm1, %v463_v2, %v460_v3 }
  0x26   :  { %v397_v6 = vld [vmem:[#allocation0 + $0x109] ss:$16 sm:%s855_s21]   ;;  %v468_v9 = vld [vmem:[#allocation0 + $0x88] ss:$16 sm:%s467_s3]   ;;  %144 = vst [vmem:[#allocation0 + $0xe0] sm:$0x3] %v674_v4 }
  0x27   :  { %v400_v7 = vld [vmem:[#allocation0 + $0x109] ss:$16 sm:%s857_s24]   ;;  %154 = vst [vmem:[#allocation0 + $0xd0] sm:$0x3] %v676_v5  ;;  %v478_v12 = vld [vmem:[#allocation0 + $0x108] ss:$16 sm:%s875_s23]   ;;  %v470_v28 = vsel %vm293_vm2, %v468_v9, %v465_v18 }
  0x28   :  { %v405_v8 = vld [vmem:[#allocation0 + $0x109] ss:$16 sm:%s864_s30]   ;;  %v402_v10 = vsel %vm285_vm0, %v400_v7, %v397_v6  ;;  %v481_v13 = vld [vmem:[#allocation0 + $0x108] ss:$16 sm:%s877_s26]   ;;  %s924_s21 = smov 3  ;;  %s950_s16 = smov 12 }
  0x29   :  { %v410_v11 = vld [vmem:[#allocation0 + $0x109] ss:$16 sm:%s866_s2]   ;;  %v407_v14 = vsel %vm289_vm1, %v405_v8, %v402_v10  ;;  %v483_v15 = vsel %vm285_vm0, %v481_v13, %v478_v12  ;;  %v486_v16 = vld [vmem:[#allocation0 + $0x108] ss:$16 sm:%s886_s11]   ;;  %v678_v21 = vld [vmem:[%s1089_s0 + $0x30] sm:$0x3] }
  0x2a   :  { %v491_v17 = vld [vmem:[#allocation0 + $0x108] ss:$16 sm:%s888_s12]   ;;  %v412_v19 = vsel %vm293_vm2, %v410_v11, %v407_v14  ;;  %v488_v20 = vsel %vm289_vm1, %v486_v16, %v483_v15  ;;  %v680_v22 = vld [vmem:[%s1089_s0 + $0x2c] sm:$0x3]  ;;  %v514_v25 = vld [vmem:[#allocation0 + $0x1] ss:$16 sm:%s513_s4]  }
  0x2b   :  { %v682_v23 = vld [vmem:[%s1089_s0 + $0x28] sm:$0x3]  ;;  %413 = vrot.lane.b32.xlu1 %v412_v19, %s717_s5  ;;  %v493_v24 = vsel %vm293_vm2, %v491_v17, %v488_v20  ;;  %v517_v26 = vld [vmem:[#allocation0 + $0x1] ss:$16 sm:%s516_s6]   ;;  %164 = vst [vmem:[#allocation0 + $0xc0] sm:$0x3] %v678_v21 }
  0x2c   :  { %v522_v27 = vld [vmem:[#allocation0 + $0x1] ss:$16 sm:%s521_s22]   ;;  %174 = vst [vmem:[#allocation0 + $0xb0] sm:$0x3] %v680_v22  ;;  %184 = vst [vmem:[#allocation0 + $0xa0] sm:$0x3] %v682_v23  ;;  %494 = vrot.lane.b32.xlu0 %v493_v24, %s718_s29  ;;  %v519_v29 = vsel %vm285_vm0, %v517_v26, %v514_v25 }
  0x2d   :  { %v527_v30 = vld [vmem:[#allocation0 + $0x1] ss:$16 sm:%s904_s27]   ;;  %v684_v31 = vld [vmem:[%s1089_s0 + $0x24] sm:$0x3]  ;;  %v524_v33 = vsel %vm289_vm1, %v522_v27, %v519_v29  ;;  %s952_s17 = smov 48  ;;  %s961_s25 = smov 192 }
  0x2e   :  { %v686_v32 = vld [vmem:[%s1089_s0 + $0x20] sm:$0x3]  ;;  %194 = vst [vmem:[#allocation0 + $0x90] sm:$0x3] %v684_v31  ;;  %v656_v34 = vld [vmem:[%s1089_s0 + $0x5c] sm:$0x3]  ;;  %v529_v36 = vsel %vm293_vm2, %v527_v30, %v524_v33 }
  0x2f   :  { %204 = vst [vmem:[#allocation0 + $0x80] sm:$0x3] %v686_v32  ;;  %v658_v35 = vld [vmem:[%s1089_s0 + $0x58] sm:$0x3]  ;;  %54 = vst [vmem:[#allocation0 + $0x170] sm:$0x3] %v656_v34  ;;  %471 = vrot.lane.b32.xlu1 %v470_v28, %s718_s29 }
  0x30   :  { %64 = vst [vmem:[#allocation0 + $0x160] sm:$0x3] %v658_v35  ;;  %v660_v37 = vld [vmem:[%s1089_s0 + $0x54] sm:$0x3]  ;;  %v662_v38 = vld [vmem:[%s1089_s0 + $0x50] sm:$0x3] }
  0x31   :  { %s969_s22 = smov 3  ;;  %74 = vst [vmem:[#allocation0 + $0x150] sm:$0x3] %v660_v37  ;;  %84 = vst [vmem:[#allocation0 + $0x140] sm:$0x3] %v662_v38  ;;  %s719_s24 = smov 8  }
  0x32   :  { %v664_v39 = vld [vmem:[%s1089_s0 + $0x4c] sm:$0x3]  ;;  %v666_v40 = vld [vmem:[%s1089_s0 + $0x48] sm:$0x3]  ;;  %v668_v41 = vld [vmem:[%s1089_s0 + $0x44] sm:$0x3]  ;;  %530 = vrot.lane.b32.xlu0 %v529_v36, %s719_s24 }
  0x33   :  { %94 = vst [vmem:[#allocation0 + $0x130] sm:$0x3] %v664_v39  ;;  %104 = vst [vmem:[#allocation0 + $0x120] sm:$0x3] %v666_v40  ;;  %v670_v42 = vld [vmem:[%s1089_s0 + $0x40] sm:$0x3] }
  0x34   :  { %114 = vst [vmem:[#allocation0 + $0x110] sm:$0x3] %v668_v41  ;;  %s985_s23 = smov 12  ;;  %s987_s26 = smov 48  ;;  %v648_v43 = vld [vmem:[%s1089_s0 + $0x6c] sm:$0x3] }
  0x35   :  { %124 = vst [vmem:[#allocation0 + $0x100] sm:$0x3] %v670_v42  ;;  %s992_s12 = smov 192  ;;  %14 = vst [vmem:[#allocation0 + $0x1b0] sm:$0x3] %v648_v43  ;;  %s1000_s13 = smov 3 }
  0x36   :  { %v650_v44 = vld [vmem:[%s1089_s0 + $0x68] sm:$0x3]  ;;  %v652_v45 = vld [vmem:[%s1089_s0 + $0x64] sm:$0x3]  ;;  %v654_v46 = vld [vmem:[%s1089_s0 + $0x60] sm:$0x3] }
  0x37   :  { %24 = vst [vmem:[#allocation0 + $0x1a0] sm:$0x3] %v650_v44  ;;  %34 = vst [vmem:[#allocation0 + $0x190] sm:$0x3] %v652_v45  ;;  %s1005_s0 = smov 12  ;;  %s281_s3 = smov 3 }
  0x38   :  { %44 = vst [vmem:[#allocation0 + $0x180] sm:$0x3] %v654_v46  ;;  %v282_v47 = vld [vmem:[#allocation0] ss:$16 sm:%s281_s3]   ;;  %s283_s4 = smov 12  ;;  %s287_s6 = smov 48 }
  0x39   :  { %v536_v48 = vld [vmem:[#allocation0 + $0x81] ss:$16 sm:%s924_s21]   ;;  %v284_v53 = vld [vmem:[#allocation0] ss:$16 sm:%s283_s4]   ;;  %s291_s21 = smov 192  ;;  %s301_s27 = smov 12 }
  0x3a   :  { %v539_v49 = vld [vmem:[#allocation0 + $0x81] ss:$16 sm:%s950_s16]   ;;  %v288_v54 = vld [vmem:[#allocation0] ss:$16 sm:%s287_s6]   ;;  %v286_v56 = vsel %vm285_vm0, %v284_v53, %v282_v47  ;;  %s340_s16 = smov 3  ;;  %s306_s7 = smov 48 }
  0x3b   :  { %v544_v50 = vld [vmem:[#allocation0 + $0x81] ss:$16 sm:%s952_s17]   ;;  %v541_v51 = vsel %vm285_vm0, %v539_v49, %v536_v48  ;;  %v290_v58 = vsel %vm289_vm1, %v288_v54, %v286_v56  ;;  %v292_v59 = vld [vmem:[#allocation0] ss:$16 sm:%s291_s21]   ;;  %s343_s17 = smov 12  ;;  %s311_s9 = smov 192 }
  0x3c   :  { %v549_v52 = vld [vmem:[#allocation0 + $0x81] ss:$16 sm:%s961_s25]   ;;  %v546_v55 = vsel %vm289_vm1, %v544_v50, %v541_v51  ;;  %s298_s25 = smov 3  ;;  %v294_v63 = vsel %vm293_vm2, %v292_v59, %v290_v58  ;;  %v302_v10 = vld [vmem:[#allocation0 + $0x80] ss:$16 sm:%s301_s27]   ;;  %s319_s10 = smov 3 }
  0x3d   :  { %v551_v57 = vsel %vm293_vm2, %v549_v52, %v546_v55  ;;  %v559_v60 = vld [vmem:[#allocation0 + $0x101] ss:$16 sm:%s969_s22]   ;;  %296 = vst.msk [vmem:[%s1090_s1] sm:$0xff] %vm295_vm3, %v294_v63   ;;  %v299_v2 = vld [vmem:[#allocation0 + $0x80] ss:$16 sm:%s298_s25]   ;;  %s322_s30 = smov 12 }
  0x3e   :  { %552 = vrot.lane.b32.xlu1 %v551_v57, %s719_s24  ;;  %v562_v61 = vld [vmem:[#allocation0 + $0x101] ss:$16 sm:%s985_s23]   ;;  %v307_v11 = vld [vmem:[#allocation0 + $0x80] ss:$16 sm:%s306_s7]   ;;  %v304_v13 = vsel %vm285_vm0, %v302_v10, %v299_v2  ;;  %s327_s2 = smov 48  ;;  %s332_s23 = smov 192 }
  0x3f   :  { %v567_v62 = vld [vmem:[#allocation0 + $0x101] ss:$16 sm:%s987_s26]   ;;  %v564_v0 = vsel %vm285_vm0, %v562_v61, %v559_v60  ;;  %v341_v6 = vld [vmem:[#allocation0 + $0x180] ss:$16 sm:%s340_s16]   ;;  %v309_v14 = vsel %vm289_vm1, %v307_v11, %v304_v13  ;;  %vm370_vm4 = vcmask 261312   ;;  %vm451_vm5 = vcmask 195712  }
  0x40   :  { %v572_v1 = vld [vmem:[#allocation0 + $0x101] ss:$16 sm:%s992_s12]   ;;  %v569_v3 = vsel %vm289_vm1, %v567_v62, %v564_v0  ;;  %v344_v9 = vld [vmem:[#allocation0 + $0x180] ss:$16 sm:%s343_s17]   ;;  %vm532_vm6 = vcmask 130112  }
  0x41   :  { %v582_v4 = vld [vmem:[#allocation0 + $0x181] ss:$16 sm:%s1000_s13]   ;;  %v574_v7 = vsel %vm293_vm2, %v572_v1, %v569_v3  ;;  %v346_v12 = vsel %vm285_vm0, %v344_v9, %v341_v6  ;;  %v312_v15 = vld [vmem:[#allocation0 + $0x80] ss:$16 sm:%s311_s9]  }
  0x42   :  { %v585_v5 = vld [vmem:[#allocation0 + $0x181] ss:$16 sm:%s1005_s0]   ;;  %575 = vrot.lane.b32.xlu0 %v574_v7, %s719_s24  ;;  %704 = vst.msk [vmem:[%s1090_s1 + $0x18] sm:$0xf] %vm295_vm3, %v346_v12   ;;  %v320_v16 = vld [vmem:[#allocation0 + $0x100] ss:$16 sm:%s319_s10]   ;;  %v314_v17 = vsel %vm293_vm2, %v312_v15, %v309_v14 }
  0x43   :  { %v587_v8 = vsel %vm285_vm0, %v585_v5, %v582_v4  ;;  %v323_v18 = vld [vmem:[#allocation0 + $0x100] ss:$16 sm:%s322_s30]   ;;  %702 = vst.msk [vmem:[%s1090_s1 + $0x8] sm:$0xff] %vm295_vm3, %v314_v17  }
  0x44   :  { %588 = vrot.lane.b32.xlu1 %v587_v8, %s719_s24  ;;  %v328_v19 = vld [vmem:[#allocation0 + $0x100] ss:$16 sm:%s327_s2]   ;;  %v325_v20 = vsel %vm285_vm0, %v323_v18, %v320_v16 }
  0x45   :  { %v333_v21 = vld [vmem:[#allocation0 + $0x100] ss:$16 sm:%s332_s23]   ;;  %v330_v22 = vsel %vm289_vm1, %v328_v19, %v325_v20 }
  0x46   :  { %v335_v23 = vsel %vm293_vm2, %v333_v21, %v330_v22 }
  0x47   :  { %703 = vst.msk [vmem:[%s1090_s1 + $0x10] sm:$0xff] %vm295_vm3, %v335_v23  }
  0x89   :  { %v369_v24 = vpop.permute.xlu0 %368   ;;  %v427_v25 = vpop.permute.xlu1 %426  }
  0x8a   :  { %371 = vst.msk [vmem:[%s1090_s1] sm:$0xff] %vm370_vm4, %v369_v24   ;;  %707 = vst.msk [vmem:[%s1090_s1 + $0x18] sm:$0xf] %vm370_vm4, %v427_v25  }
  0x8e   :  { %v508_v26 = vpop.permute.xlu1 %507  }
  0x8f   :  { %v391_v27 = vpop.permute.xlu0 %390   ;;  %710 = vst.msk [vmem:[%s1090_s1 + $0x18] sm:$0xf] %vm451_vm5, %v508_v26  }
  0x90   :  { %705 = vst.msk [vmem:[%s1090_s1 + $0x8] sm:$0xff] %vm370_vm4, %v391_v27  }
  0x93   :  { %v450_v28 = vpop.permute.xlu0 %449  }
  0x94   :  { %452 = vst.msk [vmem:[%s1090_s1] sm:$0xff] %vm451_vm5, %v450_v28  }
  0x9d   :  { %v414_v29 = vpop.permute.xlu1 %413  }
  0x9e   :  { %706 = vst.msk [vmem:[%s1090_s1 + $0x10] sm:$0xff] %vm370_vm4, %v414_v29   ;;  %v495_v30 = vpop.permute.xlu0 %494  }
  0x9f   :  { %709 = vst.msk [vmem:[%s1090_s1 + $0x10] sm:$0xff] %vm451_vm5, %v495_v30  }
  0xa1   :  { %v472_v31 = vpop.permute.xlu1 %471  }
  0xa2   :  { %708 = vst.msk [vmem:[%s1090_s1 + $0x8] sm:$0xff] %vm451_vm5, %v472_v31  }
  0xa4   :  { %v531_v32 = vpop.permute.xlu0 %530  }
  0xa5   :  { %533 = vst.msk [vmem:[%s1090_s1] sm:$0xff] %vm532_vm6, %v531_v32  }
  0xb0   :  { %v553_v33 = vpop.permute.xlu1 %552  }
  0xb1   :  { %711 = vst.msk [vmem:[%s1090_s1 + $0x8] sm:$0xff] %vm532_vm6, %v553_v33  }
  0xb4   :  { %v576_v34 = vpop.permute.xlu0 %575  }
  0xb5   :  { %712 = vst.msk [vmem:[%s1090_s1 + $0x10] sm:$0xff] %vm532_vm6, %v576_v34  }
  0xb6   :  { %v589_v35 = vpop.permute.xlu1 %588  }
  0xb7   :  { %713 = vst.msk [vmem:[%s1090_s1 + $0x18] sm:$0xf] %vm532_vm6, %v589_v35  }

// kernel: conv_transpose_sigmoid.1
= control target key start
LH: loop header
LB: loop body
LE: loop exit
PB: predicated region body
PF: predicated region fallthrough
CT: control target
= control target key end

     0   :  { %v345_v3 = vmov 0.0   ;;  %vm34_vm0 = vcmask 523264   ;;  %s486_s1 = inlined_call_operand.vmem [shape: f32[64,256], index: 1, kind: input, shape index: {}]   ;;  %s487_s0 = inlined_call_operand.vmem [shape: f32[56,64], index: 0, kind: input, shape index: {}]   ;;  %s488_s2 = inlined_call_operand.vmem [shape: f32[56,256], index: 2, kind: output, shape index: {}]  }
   0x1   :  { %v33_v0 = vld [vmem:[%s486_s1 + $0x78] sm:$0xff]  ;;  %v32_v1 = vld [vmem:[%s486_s1 + $0x70] sm:$0xff]  ;;  %v31_v2 = vld [vmem:[%s486_s1 + $0x68] sm:$0xff]  ;;  %120 = vmatprep.mubr.f32.mxu0 %v345_v3  ;;  %144 = vmatprep.mubr.f32.mxu1 %v345_v3 }
   0x2   :  { %72 = vmatprep.subr.mxu0 %v33_v0  ;;  %272 = vmatprep.subr.mxu1 %v33_v0  ;;  %v30_v4 = vld [vmem:[%s486_s1 + $0x60] sm:$0xff]  ;;  %v29_v5 = vld [vmem:[%s486_s1 + $0x58] sm:$0xff]  ;;  %v28_v6 = vld [vmem:[%s486_s1 + $0x50] sm:$0xff] }
   0x3   :  { %73 = vmatpush1.msra.mxu0 %v32_v1  ;;  %280 = vmatpush1.msra.mxu1 %v32_v1  ;;  %v27_v7 = vld [vmem:[%s486_s1 + $0x48] sm:$0xff]  ;;  %v26_v8 = vld [vmem:[%s486_s1 + $0x40] sm:$0xff]  ;;  %v25_v9 = vld [vmem:[%s486_s1 + $0x38] sm:$0xff] }
   0x4   :  { %74 = vmatprep.subr.mxu0 %v31_v2  ;;  %273 = vmatprep.subr.mxu1 %v31_v2  ;;  %v24_v10 = vld [vmem:[%s486_s1 + $0x30] sm:$0xff]  ;;  %v23_v11 = vld [vmem:[%s486_s1 + $0x28] sm:$0xff]  ;;  %v22_v12 = vld [vmem:[%s486_s1 + $0x20] sm:$0xff] }
   0x5   :  { %75 = vmatpush1.msra.mxu0 %v30_v4  ;;  %281 = vmatpush1.msra.mxu1 %v30_v4  ;;  %v21_v13 = vld [vmem:[%s486_s1 + $0x18] sm:$0xff]  ;;  %v20_v14 = vld [vmem:[%s486_s1 + $0x10] sm:$0xff]  ;;  %v19_v15 = vld [vmem:[%s486_s1 + $0x8] sm:$0xff] }
   0x6   :  { %76 = vmatprep.subr.mxu0 %v29_v5  ;;  %274 = vmatprep.subr.mxu1 %v29_v5  ;;  %v18_v16 = vld [vmem:[%s486_s1] sm:$0xff]  ;;  %v12_v19 = vld [vmem:[%s487_s0 + $0x8] sm:$0xff]  ;;  %v13_v21 = vld [vmem:[%s487_s0 + $0x10] sm:$0xff] }
   0x7   :  { %77 = vmatpush1.msra.mxu0 %v28_v6  ;;  %282 = vmatpush1.msra.mxu1 %v28_v6  ;;  %v11_v17 = vld [vmem:[%s487_s0] sm:$0xff]  ;;  %v16_v20 = vld [vmem:[%s487_s0 + $0x28] sm:$0xff]  ;;  %v17_v22 = vld [vmem:[%s487_s0 + $0x30] sm:$0xff] }
   0x8   :  { %78 = vmatprep.subr.mxu0 %v27_v7  ;;  %275 = vmatprep.subr.mxu1 %v27_v7  ;;  %v15_v18 = vld [vmem:[%s487_s0 + $0x20] sm:$0xff]  ;;  %v14_v23 = vld [vmem:[%s487_s0 + $0x18] sm:$0xff] }
   0x9   :  { %79 = vmatpush1.msra.mxu0 %v26_v8  ;;  %283 = vmatpush1.msra.mxu1 %v26_v8 }
   0xa   :  { %80 = vmatprep.subr.mxu0 %v25_v9  ;;  %276 = vmatprep.subr.mxu1 %v25_v9 }
   0xb   :  { %81 = vmatpush1.msra.mxu0 %v24_v10  ;;  %284 = vmatpush1.msra.mxu1 %v24_v10 }
   0xc   :  { %82 = vmatprep.subr.mxu0 %v23_v11  ;;  %277 = vmatprep.subr.mxu1 %v23_v11 }
   0xd   :  { %83 = vmatpush1.msra.mxu0 %v22_v12  ;;  %285 = vmatpush1.msra.mxu1 %v22_v12 }
   0xe   :  { %84 = vmatprep.subr.mxu0 %v21_v13  ;;  %278 = vmatprep.subr.mxu1 %v21_v13 }
   0xf   :  { %85 = vmatpush1.msra.mxu0 %v20_v14  ;;  %286 = vmatpush1.msra.mxu1 %v20_v14 }
  0x10   :  { %86 = vmatprep.subr.mxu0 %v19_v15  ;;  %279 = vmatprep.subr.mxu1 %v19_v15 }
  0x11   :  { %87 = vmatpush1.msra.mxu0 %v18_v16  ;;  %287 = vmatpush1.msra.mxu1 %v18_v16 }
  0x12   :  { %265 = vmatmul.mubr.msk.f32.vlgmr.msra.gmra.mxu0 %vm34_vm0, %v11_v17  ;;  %269 = vmatmul.mubr.msk.f32.vlgmr.msra.gmra.mxu1 %vm34_vm0, %v15_v18 }
  0x13   :  { %126 = vmatprep.mubr.f32.mxu0 %v345_v3  ;;  %150 = vmatprep.mubr.f32.mxu1 %v345_v3 }
  0x16   :  { %266 = vmatmul.mubr.msk.f32.gmra.mxu0 %vm34_vm0, %v12_v19  ;;  %270 = vmatmul.mubr.msk.f32.gmra.mxu1 %vm34_vm0, %v16_v20 }
  0x17   :  { %132 = vmatprep.mubr.f32.mxu0 %v345_v3  ;;  %156 = vmatprep.mubr.f32.mxu1 %v345_v3 }
  0x1a   :  { %267 = vmatmul.mubr.msk.f32.gmra.mxu0 %vm34_vm0, %v13_v21  ;;  %271 = vmatmul.mubr.msk.f32.gmra.mxu1 %vm34_vm0, %v17_v22 }
  0x1b   :  { %138 = vmatprep.mubr.f32.mxu0 %v345_v3 }
  0x1e   :  { %268 = vmatmul.mubr.msk.f32.gmra.mxu0 %vm34_vm0, %v14_v23 }
  0xd2   :  { %v122_v24 = vpop.f32.mrf.mxu0  ;;  %v146_v25 = vpop.f32.mrf.mxu1 }
  0xd3   :  { %v163_v26 = vsub.f32 0.0, %v122_v24  ;;  %v171_v27 = vsub.f32 0.0, %v146_v25 }
  0xd4   :  { %v124_v28 = vpop.f32.mrf.mxu0  ;;  %v148_v29 = vpop.f32.mrf.mxu1 }
  0xd5   :  { %v177_v30 = vmul.f32 1.442695, %v163_v26  ;;  %v164_v31 = vsub.f32 0.0, %v124_v28  ;;  %v193_v32 = vmul.f32 1.442695, %v171_v27  ;;  %v172_v33 = vsub.f32 0.0, %v148_v29 }
  0xd6   :  { %v128_v34 = vpop.f32.mrf.mxu0  ;;  %v152_v35 = vpop.f32.mrf.mxu1 }
  0xd7   :  { %289 = vpow2.f32 %v177_v30  ;;  %v179_v36 = vmul.f32 1.442695, %v164_v31  ;;  %v165_v37 = vsub.f32 0.0, %v128_v34  ;;  %v195_v38 = vmul.f32 1.442695, %v172_v33 }
  0xd8   :  { %291 = vpow2.f32 %v193_v32  ;;  %v130_v39 = vpop.f32.mrf.mxu0  ;;  %v173_v40 = vsub.f32 0.0, %v152_v35  ;;  %v154_v41 = vpop.f32.mrf.mxu1 }
  0xd9   :  { %293 = vpow2.f32 %v179_v36  ;;  %v181_v42 = vmul.f32 1.442695, %v165_v37  ;;  %v166_v43 = vsub.f32 0.0, %v130_v39  ;;  %v174_v44 = vsub.f32 0.0, %v154_v41 }
  0xda   :  { %295 = vpow2.f32 %v195_v38  ;;  %v197_v45 = vmul.f32 1.442695, %v173_v40  ;;  %v134_v46 = vpop.f32.mrf.mxu0  ;;  %v158_v47 = vpop.f32.mrf.mxu1 }
  0xdb   :  { %297 = vpow2.f32 %v181_v42  ;;  %v183_v48 = vmul.f32 1.442695, %v166_v43  ;;  %v167_v49 = vsub.f32 0.0, %v134_v46  ;;  %v199_v50 = vmul.f32 1.442695, %v174_v44 }
  0xdc   :  { %299 = vpow2.f32 %v197_v45  ;;  %v136_v51 = vpop.f32.mrf.mxu0  ;;  %v175_v52 = vsub.f32 0.0, %v158_v47  ;;  %v160_v53 = vpop.f32.mrf.mxu1 }
  0xdd   :  { %301 = vpow2.f32 %v183_v48  ;;  %v185_v54 = vmul.f32 1.442695, %v167_v49  ;;  %v168_v55 = vsub.f32 0.0, %v136_v51  ;;  %v176_v56 = vsub.f32 0.0, %v160_v53 }
  0xde   :  { %303 = vpow2.f32 %v199_v50  ;;  %v201_v57 = vmul.f32 1.442695, %v175_v52  ;;  %v140_v58 = vpop.f32.mrf.mxu0 }
  0xdf   :  { %305 = vpow2.f32 %v185_v54  ;;  %v187_v59 = vmul.f32 1.442695, %v168_v55  ;;  %v169_v60 = vsub.f32 0.0, %v140_v58  ;;  %v203_v61 = vmul.f32 1.442695, %v176_v56 }
  0xe0   :  { %307 = vpow2.f32 %v201_v57  ;;  %v142_v62 = vpop.f32.mrf.mxu0 }
  0xe1   :  { %309 = vpow2.f32 %v187_v59  ;;  %v189_v63 = vmul.f32 1.442695, %v169_v60  ;;  %v170_v0 = vsub.f32 0.0, %v142_v62 }
  0xe2   :  { %311 = vpow2.f32 %v203_v61 }
  0xe3   :  { %313 = vpow2.f32 %v189_v63  ;;  %v191_v1 = vmul.f32 1.442695, %v170_v0 }
  0xe4   :  { %v290_v2 = vpop.eup %289 }
  0xe5   :  { %v292_v3 = vpop.eup %291  ;;  %v205_v4 = vadd.f32 1.0, %v290_v2  ;;  %315 = vpow2.f32 %v191_v1 }
  0xe6   :  { %v294_v5 = vpop.eup %293  ;;  %v213_v6 = vadd.f32 1.0, %v292_v3 }
  0xe7   :  { %v296_v7 = vpop.eup %295  ;;  %317 = vrcp.f32 %v205_v4  ;;  %v206_v8 = vadd.f32 1.0, %v294_v5 }
  0xe8   :  { %v298_v9 = vpop.eup %297  ;;  %319 = vrcp.f32 %v213_v6  ;;  %v214_v10 = vadd.f32 1.0, %v296_v7 }
  0xe9   :  { %v300_v11 = vpop.eup %299  ;;  %321 = vrcp.f32 %v206_v8  ;;  %v207_v12 = vadd.f32 1.0, %v298_v9 }
  0xea   :  { %v302_v13 = vpop.eup %301  ;;  %323 = vrcp.f32 %v214_v10  ;;  %v215_v14 = vadd.f32 1.0, %v300_v11 }
  0xeb   :  { %v304_v15 = vpop.eup %303  ;;  %325 = vrcp.f32 %v207_v12  ;;  %v208_v16 = vadd.f32 1.0, %v302_v13 }
  0xec   :  { %v306_v17 = vpop.eup %305  ;;  %327 = vrcp.f32 %v215_v14  ;;  %v216_v18 = vadd.f32 1.0, %v304_v15 }
  0xed   :  { %v308_v19 = vpop.eup %307  ;;  %329 = vrcp.f32 %v208_v16  ;;  %v209_v20 = vadd.f32 1.0, %v306_v17 }
  0xee   :  { %v310_v21 = vpop.eup %309  ;;  %331 = vrcp.f32 %v216_v18  ;;  %v217_v22 = vadd.f32 1.0, %v308_v19 }
  0xef   :  { %v312_v23 = vpop.eup %311  ;;  %333 = vrcp.f32 %v209_v20  ;;  %v210_v24 = vadd.f32 1.0, %v310_v21 }
  0xf0   :  { %v314_v25 = vpop.eup %313  ;;  %335 = vrcp.f32 %v217_v22  ;;  %v218_v26 = vadd.f32 1.0, %v312_v23 }
  0xf1   :  { %337 = vrcp.f32 %v210_v24  ;;  %v211_v27 = vadd.f32 1.0, %v314_v25 }
  0xf2   :  { %v316_v28 = vpop.eup %315  ;;  %339 = vrcp.f32 %v218_v26 }
  0xf3   :  { %341 = vrcp.f32 %v211_v27  ;;  %v212_v29 = vadd.f32 1.0, %v316_v28 }
  0xf4   :  { %v318_v30 = vpop.eup %317 }
  0xf5   :  { %v320_v31 = vpop.eup %319  ;;  %247 = vst [vmem:[%s488_s2] sm:$0xff] %v318_v30  ;;  %343 = vrcp.f32 %v212_v29 }
  0xf6   :  { %v322_v32 = vpop.eup %321  ;;  %255 = vst [vmem:[%s488_s2 + $0x40] sm:$0xff] %v320_v31 }
  0xf7   :  { %v324_v33 = vpop.eup %323  ;;  %248 = vst [vmem:[%s488_s2 + $0x8] sm:$0xff] %v322_v32 }
  0xf8   :  { %v326_v34 = vpop.eup %325  ;;  %256 = vst [vmem:[%s488_s2 + $0x48] sm:$0xff] %v324_v33 }
  0xf9   :  { %v328_v35 = vpop.eup %327  ;;  %249 = vst [vmem:[%s488_s2 + $0x10] sm:$0xff] %v326_v34 }
  0xfa   :  { %v330_v36 = vpop.eup %329  ;;  %257 = vst [vmem:[%s488_s2 + $0x50] sm:$0xff] %v328_v35 }
  0xfb   :  { %v332_v37 = vpop.eup %331  ;;  %250 = vst [vmem:[%s488_s2 + $0x18] sm:$0xff] %v330_v36 }
  0xfc   :  { %v334_v38 = vpop.eup %333  ;;  %258 = vst [vmem:[%s488_s2 + $0x58] sm:$0xff] %v332_v37 }
  0xfd   :  { %v336_v39 = vpop.eup %335  ;;  %251 = vst [vmem:[%s488_s2 + $0x20] sm:$0xff] %v334_v38 }
  0xfe   :  { %v338_v40 = vpop.eup %337  ;;  %259 = vst [vmem:[%s488_s2 + $0x60] sm:$0xff] %v336_v39 }
  0xff   :  { %v340_v41 = vpop.eup %339  ;;  %252 = vst [vmem:[%s488_s2 + $0x28] sm:$0xff] %v338_v40 }
 0x100   :  { %v342_v42 = vpop.eup %341  ;;  %260 = vst [vmem:[%s488_s2 + $0x68] sm:$0xff] %v340_v41 }
 0x101   :  { %253 = vst [vmem:[%s488_s2 + $0x30] sm:$0xff] %v342_v42 }
 0x102   :  { %v344_v43 = vpop.eup %343 }
 0x103   :  { %254 = vst [vmem:[%s488_s2 + $0x38] sm:$0xff] %v344_v43 }

</bundles_post_ra>
